<compile_context>
chip_gen: v6e
topology: v6e:2x2x1
jax: 0.10.0
libtpu: 0.0.40
codegen_flags: <defaults>
</compile_context>

<pallas_src>
from functools import partial

import jax
import jax.numpy as jnp
from jax.experimental import pallas as pl
from jax.experimental.pallas import tpu as pltpu


def get_conv_output_size(input_size, kernel_size, stride, padding):
    return (input_size - kernel_size + 2 * padding) // stride + 1


def _window_prod(x, axis, k, stride, out_len):
    """Product over a length-k sliding window (step `stride`) along `axis` of a 3D value."""
    acc = None
    for t in range(k):
        lo = t
        hi = t + stride * (out_len - 1) + 1
        if axis == 1:
            sl = x[:, lo:hi:stride, :]
        else:
            sl = x[:, :, lo:hi:stride]
        acc = sl if acc is None else acc * sl
    return acc


# ----------------------------------------------------------------------------
# Kernels.  Inputs are the raw probabilities; q = 1 - p and the neutral (1.0)
# padding border are produced in VMEM.
#   p_ref    : (TBC, H,  W )  probabilities
#   o_ref    : (TBC, oh, ow)  1 - prod over the k*k window of (1 - p)
#   qpad_ref : (TBC, Hp, Wp)  VMEM scratch (padded kernel only)
# ----------------------------------------------------------------------------
def _sign_or_pool_kernel_padded(p_ref, o_ref, qpad_ref, *, k, stride, padding,
                                H, W, oh, ow):
    tbc = qpad_ref.shape[0]
    Hp = H + 2 * padding
    Wp = W + 2 * padding

    # Neutral 1.0 border (only the strips; interior is fully overwritten below).
    # Re-done every grid step so megacore sharding of the "parallel" axis stays correct.
    qpad_ref[:, :padding, :] = jnp.ones((tbc, padding, Wp), jnp.float32)
    qpad_ref[:, H + padding:, :] = jnp.ones((tbc, padding, Wp), jnp.float32)
    qpad_ref[:, :, :padding] = jnp.ones((tbc, Hp, padding), jnp.float32)
    qpad_ref[:, :, W + padding:] = jnp.ones((tbc, Hp, padding), jnp.float32)

    # Interior: q = 1 - p, computed in VMEM (no extra HBM pass).
    qpad_ref[:, padding:padding + H, padding:padding + W] = (
        1.0 - p_ref[...].astype(jnp.float32)
    )

    q = qpad_ref[...]                                                # (TBC, Hp, Wp)
    col = _window_prod(q, axis=2, k=k, stride=stride, out_len=ow)    # (TBC, Hp, ow)
    acc = _window_prod(col, axis=1, k=k, stride=stride, out_len=oh)  # (TBC, oh, ow)
    o_ref[...] = (1.0 - acc).astype(o_ref.dtype)


def _sign_or_pool_kernel_nopad(p_ref, o_ref, *, k, stride, oh, ow):
    q = 1.0 - p_ref[...].astype(jnp.float32)                         # (TBC, H, W)
    col = _window_prod(q, axis=2, k=k, stride=stride, out_len=ow)    # (TBC, H, ow)
    acc = _window_prod(col, axis=1, k=k, stride=stride, out_len=oh)  # (TBC, oh, ow)
    o_ref[...] = (1.0 - acc).astype(o_ref.dtype)


def sign_or_pool_forward(p_x, *, kernel_size, stride=1, padding=0,
                         vmem_budget_bytes=8 * 1024 * 1024):
    """Training-mode forward of SignOrPool2d.

    p_x: (B, C, H, W) float probabilities (NCHW).
    Returns (B, C, out_h, out_w) float32.
    """
    B, C, H, W = p_x.shape
    k = kernel_size
    oh = get_conv_output_size(H, k, stride, padding)
    ow = get_conv_output_size(W, k, stride, padding)
    Hp, Wp = H + 2 * padding, W + 2 * padding
    BC = B * C

    # Free metadata reshape; no HBM pass, no transpose.
    p3 = p_x.reshape(BC, H, W).astype(jnp.float32)

    # B*C tile from a conservative VMEM budget (input/output double-buffered,
    # padded scratch + temporaries single-buffered).  Fits the default scoped
    # VMEM limit on v5e/v6e/v7x.
    per_row_bytes = 4 * (2 * H * W + 2 * oh * ow + 2 * Hp * Wp + Hp * ow + 2 * oh * ow)
    tbc = max(1, min(BC, vmem_budget_bytes // max(1, per_row_bytes)))
    tbc = min(tbc, 1024)
    n_tiles = pl.cdiv(BC, tbc)   # partial last block handled by Pallas (OOB writes dropped)

    if padding > 0:
        kernel = partial(_sign_or_pool_kernel_padded, k=k, stride=stride,
                         padding=padding, H=H, W=W, oh=oh, ow=ow)
        scratch = [pltpu.VMEM((tbc, Hp, Wp), jnp.float32)]
    else:
        kernel = partial(_sign_or_pool_kernel_nopad, k=k, stride=stride, oh=oh, ow=ow)
        scratch = []

    out = pl.pallas_call(
        kernel,
        out_shape=jax.ShapeDtypeStruct((BC, oh, ow), jnp.float32),
        grid_spec=pltpu.PrefetchScalarGridSpec(
            num_scalar_prefetch=0,
            grid=(n_tiles,),
            in_specs=[pl.BlockSpec((tbc, H, W), lambda i: (i, 0, 0))],
            out_specs=pl.BlockSpec((tbc, oh, ow), lambda i: (i, 0, 0)),
            scratch_shapes=scratch,
        ),
        compiler_params=pltpu.CompilerParams(
            dimension_semantics=("parallel",),
        ),
    )(p3)

    return out.reshape(B, C, oh, ow)


def _reference(p_x, kernel_size, stride, padding):
    """Pure-JAX reference of the training-mode forward (matches torch unfold+prod)."""
    B, C, H, W = p_x.shape
    k = kernel_size
    oh = get_conv_output_size(H, k, stride, padding)
    ow = get_conv_output_size(W, k, stride, padding)
    xp = jnp.pad(p_x, ((0, 0), (0, 0), (padding, padding), (padding, padding)))
    acc = jnp.ones((B, C, oh, ow), jnp.float32)
    for ki in range(k):
        for kj in range(k):
            acc = acc * (
                1.0
                - xp[
                    :,
                    :,
                    ki: ki + stride * (oh - 1) + 1: stride,
                    kj: kj + stride * (ow - 1) + 1: stride,
                ]
            )
    return 1.0 - acc


if __name__ == "__main__":
    key = jax.random.PRNGKey(0)

    # Config 1: B=2, C=4, H=W=16, k=3, stride=1, pad=1  (padded-scratch kernel path)
    B, C, H, W = 2, 4, 16, 16
    kernel_size, stride, padding = 3, 1, 1
    p_x = jax.random.uniform(key, (B, C, H, W), dtype=jnp.float32)

    out = sign_or_pool_forward(
        p_x, kernel_size=kernel_size, stride=stride, padding=padding
    )
    out = jax.block_until_ready(out)

    oh = get_conv_output_size(H, kernel_size, stride, padding)
    ow = get_conv_output_size(W, kernel_size, stride, padding)
    assert out.shape == (B, C, oh, ow), out.shape
    ref = _reference(p_x, kernel_size, stride, padding)
    assert jnp.allclose(out, ref, atol=1e-6, rtol=1e-6), (
        float(jnp.max(jnp.abs(out - ref)))
    )

    # Config 2: no padding (nopad kernel path), k=2, stride=1
    kernel_size2, stride2, padding2 = 2, 1, 0
    out2 = sign_or_pool_forward(
        p_x, kernel_size=kernel_size2, stride=stride2, padding=padding2
    )
    out2 = jax.block_until_ready(out2)
    ref2 = _reference(p_x, kernel_size2, stride2, padding2)
    assert out2.shape == ref2.shape, (out2.shape, ref2.shape)
    assert jnp.allclose(out2, ref2, atol=1e-6, rtol=1e-6), (
        float(jnp.max(jnp.abs(out2 - ref2)))
    )

    print("KERNEL_OK")
</pallas_src>

<mosaic_0001>
module attributes {stable_mosaic.version = 11 : i64} {
  func.func @_sign_or_pool_kernel_padded(%arg0: i32, %arg1: memref<8x16x16xf32, #tpu.memory_space<vmem>>, %arg2: memref<8x16x16xf32, #tpu.memory_space<vmem>>, %arg3: memref<8x18x18xf32, #tpu.memory_space<vmem>>) attributes {dimension_semantics = [#tpu.dimension_semantics<parallel>], iteration_bounds = array<i64: 1>, scalar_prefetch = 0 : i64, scratch_operands = 1 : i64, tpu.core_type = #tpu.core_type<tc>, window_params = [{transform_indices = @transform_0, window_bounds = array<i64: 8, 16, 16>}, {transform_indices = @transform_1, window_bounds = array<i64: 8, 16, 16>}]} {
    %cst = arith.constant 1.000000e+00 : f32
    %0 = vector.broadcast %cst : f32 to vector<8x1x18xf32>
    %c0 = arith.constant 0 : index
    %c0_0 = arith.constant 0 : index
    %c0_1 = arith.constant 0 : index
    %1 = vector.load %arg3[%c0, %c0_0, %c0_1] : memref<8x18x18xf32, #tpu.memory_space<vmem>>, vector<8x1x18xf32>
    tpu.vector_store %arg3[%c0, %c0_0, %c0_1], %0 {strides = array<i32>} : memref<8x18x18xf32, #tpu.memory_space<vmem>>, vector<8x1x18xf32>,
    %cst_2 = arith.constant 1.000000e+00 : f32
    %2 = vector.broadcast %cst_2 : f32 to vector<8x1x18xf32>
    %c0_3 = arith.constant 0 : index
    %c17 = arith.constant 17 : index
    %c0_4 = arith.constant 0 : index
    %3 = vector.load %arg3[%c0_3, %c17, %c0_4] : memref<8x18x18xf32, #tpu.memory_space<vmem>>, vector<8x1x18xf32>
    tpu.vector_store %arg3[%c0_3, %c17, %c0_4], %2 {strides = array<i32>} : memref<8x18x18xf32, #tpu.memory_space<vmem>>, vector<8x1x18xf32>,
    %cst_5 = arith.constant 1.000000e+00 : f32
    %4 = vector.broadcast %cst_5 : f32 to vector<8x18x1xf32>
    %c0_6 = arith.constant 0 : index
    %c0_7 = arith.constant 0 : index
    %c0_8 = arith.constant 0 : index
    %5 = vector.load %arg3[%c0_6, %c0_7, %c0_8] : memref<8x18x18xf32, #tpu.memory_space<vmem>>, vector<8x18x1xf32>
    tpu.vector_store %arg3[%c0_6, %c0_7, %c0_8], %4 {strides = array<i32>} : memref<8x18x18xf32, #tpu.memory_space<vmem>>, vector<8x18x1xf32>,
    %cst_9 = arith.constant 1.000000e+00 : f32
    %6 = vector.broadcast %cst_9 : f32 to vector<8x18x1xf32>
    %c0_10 = arith.constant 0 : index
    %c0_11 = arith.constant 0 : index
    %c17_12 = arith.constant 17 : index
    %7 = vector.load %arg3[%c0_10, %c0_11, %c17_12] : memref<8x18x18xf32, #tpu.memory_space<vmem>>, vector<8x18x1xf32>
    tpu.vector_store %arg3[%c0_10, %c0_11, %c17_12], %6 {strides = array<i32>} : memref<8x18x18xf32, #tpu.memory_space<vmem>>, vector<8x18x1xf32>,
    %c0_13 = arith.constant 0 : index
    %c0_14 = arith.constant 0 : index
    %c0_15 = arith.constant 0 : index
    %8 = vector.load %arg1[%c0_13, %c0_14, %c0_15] : memref<8x16x16xf32, #tpu.memory_space<vmem>>, vector<8x16x16xf32>
    %cst_16 = arith.constant 1.000000e+00 : f32
    %9 = vector.broadcast %cst_16 : f32 to vector<8x16x16xf32>
    %10 = arith.subf %9, %8 : vector<8x16x16xf32>
    %c0_17 = arith.constant 0 : index
    %c1 = arith.constant 1 : index
    %c1_18 = arith.constant 1 : index
    %11 = vector.load %arg3[%c0_17, %c1, %c1_18] : memref<8x18x18xf32, #tpu.memory_space<vmem>>, vector<8x16x16xf32>
    tpu.vector_store %arg3[%c0_17, %c1, %c1_18], %10 {strides = array<i32>} : memref<8x18x18xf32, #tpu.memory_space<vmem>>, vector<8x16x16xf32>,
    %c0_19 = arith.constant 0 : index
    %c0_20 = arith.constant 0 : index
    %c0_21 = arith.constant 0 : index
    %12 = vector.load %arg3[%c0_19, %c0_20, %c0_21] : memref<8x18x18xf32, #tpu.memory_space<vmem>>, vector<8x18x18xf32>
    %13 = vector.extract_strided_slice %12 {offsets = [0, 0, 0], sizes = [8, 18, 16], strides = [1, 1, 1]} : vector<8x18x18xf32> to vector<8x18x16xf32>
    %14 = vector.extract_strided_slice %12 {offsets = [0, 0, 1], sizes = [8, 18, 16], strides = [1, 1, 1]} : vector<8x18x18xf32> to vector<8x18x16xf32>
    %15 = arith.mulf %13, %14 : vector<8x18x16xf32>
    %16 = vector.extract_strided_slice %12 {offsets = [0, 0, 2], sizes = [8, 18, 16], strides = [1, 1, 1]} : vector<8x18x18xf32> to vector<8x18x16xf32>
    %17 = arith.mulf %15, %16 : vector<8x18x16xf32>
    %18 = vector.extract_strided_slice %17 {offsets = [0, 0, 0], sizes = [8, 16, 16], strides = [1, 1, 1]} : vector<8x18x16xf32> to vector<8x16x16xf32>
    %19 = vector.extract_strided_slice %17 {offsets = [0, 1, 0], sizes = [8, 16, 16], strides = [1, 1, 1]} : vector<8x18x16xf32> to vector<8x16x16xf32>
    %20 = arith.mulf %18, %19 : vector<8x16x16xf32>
    %21 = vector.extract_strided_slice %17 {offsets = [0, 2, 0], sizes = [8, 16, 16], strides = [1, 1, 1]} : vector<8x18x16xf32> to vector<8x16x16xf32>
    %22 = arith.mulf %20, %21 : vector<8x16x16xf32>
    %cst_22 = arith.constant 1.000000e+00 : f32
    %23 = vector.broadcast %cst_22 : f32 to vector<8x16x16xf32>
    %24 = arith.subf %23, %22 : vector<8x16x16xf32>
    %c0_23 = arith.constant 0 : index
    %c0_24 = arith.constant 0 : index
    %c0_25 = arith.constant 0 : index
    %25 = vector.load %arg2[%c0_23, %c0_24, %c0_25] : memref<8x16x16xf32, #tpu.memory_space<vmem>>, vector<8x16x16xf32>
    tpu.vector_store %arg2[%c0_23, %c0_24, %c0_25], %24 {strides = array<i32>} : memref<8x16x16xf32, #tpu.memory_space<vmem>>, vector<8x16x16xf32>,
    return
  }
  func.func @transform_0(%arg0: i32) -> (i32, i32, i32) {
    %c0_i32 = arith.constant 0 : i32
    %c0_i32_0 = arith.constant 0 : i32
    %c0_i32_1 = arith.constant 0 : i32
    return %arg0, %c0_i32, %c0_i32_0 : i32, i32, i32
  }
  func.func @transform_1(%arg0: i32) -> (i32, i32, i32) {
    %c0_i32 = arith.constant 0 : i32
    %c0_i32_0 = arith.constant 0 : i32
    %c0_i32_1 = arith.constant 0 : i32
    return %arg0, %c0_i32, %c0_i32_0 : i32, i32, i32
  }
}

</mosaic_0001>

<bundles_post_ra>
// kernel: tpu_custom_call.1
= control target key start
LH: loop header
LB: loop body
LE: loop exit
PB: predicated region body
PF: predicated region fallthrough
CT: control target
= control target key end

     0   :  { %6 = vsyncpa [#allocation4], 0  ;;  %s1144_s0 = inlined_call_operand.hbm [shape: f32[8,16,16], index: 0, kind: input, shape index: {}]   ;;  %s1145_s1 = inlined_call_operand.hbm [shape: f32[8,16,16], index: 1, kind: output, shape index: {}]  }
   0x1   :  { %7 = vsyncpa [#allocation5], 0  ;;  %s717_s6 = smov [#allocation3]  }
   0x2   :  { %s13_s7 = sshll.u32 %s717_s6, 4  ;;  %s14_s7 = int_to_ptr.vmem [resolvable:$true] %s13_s7 }
   0x3   :  { %s681_s8 = scalar_lea.vmem %s14_s7, 2048  ;;  %p686_p1 = scmp.lt.s32.totalorder %s14_s7, %s14_s7 }
   0x4   :  { %p682_p0 = scmp.ne.s32.totalorder %s14_s7, %s681_s8  ;;  %p687_p2 = scmp.lt.s32.totalorder %s681_s8, %s681_s8 }
   0x6   :  { %p688_p3 = por %p687_p2, %p686_p1 }
   0x8   :  { %p689_p4 = pnand %p688_p3, %p682_p0 }
   0xa   :  { %692 = shalt.err (!%p689_p4)
}
   0xb   :  { %s718_s9 = smov 128   ;;  %s719_s10 = smov 8  }
   0xc   :  { %19 = dma.hbm_to_vmem [thread:$0]  %s1144_s0, 2048, %s14_s7, [#allocation4], %s718_s9, %s718_s9, %s719_s10  }
   0xd   :  { %713 = dma.done.wait [#allocation4], 2048  }
   0xe   :  { %714 = vsyncadd [#allocation4], 4294965248  ;;  %vm23_vm0 = vcmask 139264   ;;  %vm40_vm1 = vcmask 7168   ;;  %vm66_vm2 = vcmask 146568   ;;  %v720_v0 = vmov 1.0  }
   0xf   :  { %24 = vst.msk [vmem:[#allocation2] sm:$0x1] %vm23_vm0, %v720_v0  ;;  %25 = vst.msk [vmem:[#allocation2 + $0x18] sm:$0x1] %vm23_vm0, %v720_v0  ;;  %vm43_vm3 = vcmask 1024   ;;  %vm69_vm4 = vcmask 140424  }
  0x10   :  { %42 = vst.msk [vmem:[#allocation2 + $0x8] sm:$0xff] %vm40_vm1, %v720_v0  ;;  %46 = vst.msk [vmem:[#allocation2 + $0x20] sm:$0xff] %vm40_vm1, %v720_v0  ;;  %v92_v1 = vld [vmem:[#allocation3] sm:$0xff]  ;;  %v94_v2 = vld [vmem:[#allocation3 + $0x10] sm:$0xff]  ;;  %s721_s0 = smov 1   ;;  %vm188_vm5 = vcmask 138248  }
  0x11   :  { %26 = vst.msk [vmem:[#allocation2 + $0x30] sm:$0x1] %vm23_vm0, %v720_v0  ;;  %27 = vst.msk [vmem:[#allocation2 + $0x48] sm:$0x1] %vm23_vm0, %v720_v0  ;;  %v93_v3 = vld [vmem:[#allocation3 + $0x8] sm:$0xff]  ;;  %v108_v4 = vsub.f32 1.0, %v92_v1 }
  0x12   :  { %28 = vst.msk [vmem:[#allocation2 + $0x60] sm:$0x1] %vm23_vm0, %v720_v0  ;;  %29 = vst.msk [vmem:[#allocation2 + $0x78] sm:$0x1] %vm23_vm0, %v720_v0  ;;  %v110_v5 = vsub.f32 1.0, %v94_v2  ;;  %v95_v6 = vld [vmem:[#allocation3 + $0x18] sm:$0xff] }
  0x13   :  { %30 = vst.msk [vmem:[#allocation2 + $0x90] sm:$0x1] %vm23_vm0, %v720_v0  ;;  %31 = vst.msk [vmem:[#allocation2 + $0xa8] sm:$0x1] %vm23_vm0, %v720_v0  ;;  %140 = vrot.lane.b32.xlu0 %v108_v4, %s721_s0  ;;  %v109_v7 = vsub.f32 1.0, %v93_v3  ;;  %v111_v8 = vsub.f32 1.0, %v95_v6 }
  0x14   :  { %32 = vst.msk [vmem:[#allocation2 + $0x11] sm:$0x1] %vm23_vm0, %v720_v0  ;;  %33 = vst.msk [vmem:[#allocation2 + $0x29] sm:$0x1] %vm23_vm0, %v720_v0  ;;  %144 = vrot.lane.b32.xlu1 %v110_v5, %s721_s0  ;;  %v96_v9 = vld [vmem:[#allocation3 + $0x20] sm:$0xff]  ;;  %v97_v10 = vld [vmem:[#allocation3 + $0x28] sm:$0xff] }
  0x15   :  { %34 = vst.msk [vmem:[#allocation2 + $0x41] sm:$0x1] %vm23_vm0, %v720_v0  ;;  %35 = vst.msk [vmem:[#allocation2 + $0x59] sm:$0x1] %vm23_vm0, %v720_v0  ;;  %v112_v11 = vsub.f32 1.0, %v96_v9  ;;  %v113_v12 = vsub.f32 1.0, %v97_v10 }
  0x16   :  { %36 = vst.msk [vmem:[#allocation2 + $0x71] sm:$0x1] %vm23_vm0, %v720_v0  ;;  %37 = vst.msk [vmem:[#allocation2 + $0x89] sm:$0x1] %vm23_vm0, %v720_v0  ;;  %v99_v13 = vld [vmem:[#allocation3 + $0x38] sm:$0xff]  ;;  %v98_v14 = vld [vmem:[#allocation3 + $0x30] sm:$0xff] }
  0x17   :  { %38 = vst.msk [vmem:[#allocation2 + $0xa1] sm:$0x1] %vm23_vm0, %v720_v0  ;;  %39 = vst.msk [vmem:[#allocation2 + $0xb9] sm:$0x1] %vm23_vm0, %v720_v0  ;;  %142 = vrot.lane.b32.xlu0 %v109_v7, %s721_s0  ;;  %v115_v15 = vsub.f32 1.0, %v99_v13  ;;  %v114_v16 = vsub.f32 1.0, %v98_v14 }
  0x18   :  { %49 = vst.msk [vmem:[#allocation2 + $0x38] sm:$0xff] %vm40_vm1, %v720_v0  ;;  %52 = vst.msk [vmem:[#allocation2 + $0x50] sm:$0xff] %vm40_vm1, %v720_v0  ;;  %146 = vrot.lane.b32.xlu1 %v111_v8, %s721_s0  ;;  %v100_v17 = vld [vmem:[#allocation3 + $0x40] sm:$0xff]  ;;  %v101_v18 = vld [vmem:[#allocation3 + $0x48] sm:$0xff]  ;;  %s722_s13 = smov 127   ;;  %s723_s14 = smov 126  }
  0x19   :  { %55 = vst.msk [vmem:[#allocation2 + $0x68] sm:$0xff] %vm40_vm1, %v720_v0  ;;  %58 = vst.msk [vmem:[#allocation2 + $0x80] sm:$0xff] %vm40_vm1, %v720_v0  ;;  %v116_v19 = vsub.f32 1.0, %v100_v17  ;;  %v117_v20 = vsub.f32 1.0, %v101_v18  ;;  %v103_v21 = vld [vmem:[#allocation3 + $0x58] sm:$0xff]  ;;  %v102_v22 = vld [vmem:[#allocation3 + $0x50] sm:$0xff] }
  0x1a   :  { %61 = vst.msk [vmem:[#allocation2 + $0x98] sm:$0xff] %vm40_vm1, %v720_v0  ;;  %64 = vst.msk [vmem:[#allocation2 + $0xb0] sm:$0xff] %vm40_vm1, %v720_v0  ;;  %v119_v23 = vsub.f32 1.0, %v103_v21  ;;  %v118_v24 = vsub.f32 1.0, %v102_v22  ;;  %v104_v25 = vld [vmem:[#allocation3 + $0x60] sm:$0xff]  ;;  %v105_v26 = vld [vmem:[#allocation3 + $0x68] sm:$0xff] }
  0x1b   :  { %41 = vst.msk [vmem:[#allocation2] sm:$0xff] %vm40_vm1, %v720_v0  ;;  %45 = vst.msk [vmem:[#allocation2 + $0x18] sm:$0xff] %vm40_vm1, %v720_v0  ;;  %148 = vrot.lane.b32.xlu0 %v112_v11, %s721_s0  ;;  %v120_v27 = vsub.f32 1.0, %v104_v25  ;;  %v121_v28 = vsub.f32 1.0, %v105_v26  ;;  %v107_v29 = vld [vmem:[#allocation3 + $0x78] sm:$0xff]  ;;  %v106_v30 = vld [vmem:[#allocation3 + $0x70] sm:$0xff] }
  0x1c   :  { %68 = vst.msk [vmem:[#allocation2 + $0x8] sm:$0xff] %vm66_vm2, %v720_v0  ;;  %72 = vst.msk [vmem:[#allocation2 + $0x20] sm:$0xff] %vm66_vm2, %v720_v0  ;;  %150 = vrot.lane.b32.xlu1 %v113_v12, %s721_s0  ;;  %v123_v31 = vsub.f32 1.0, %v107_v29  ;;  %v122_v32 = vsub.f32 1.0, %v106_v30  ;;  %vm469_vm6 = vcmask 1046528   ;;  %vm542_vm7 = vcmask 1045504  }
  0x1d   :  { %48 = vst.msk [vmem:[#allocation2 + $0x30] sm:$0xff] %vm40_vm1, %v720_v0  ;;  %51 = vst.msk [vmem:[#allocation2 + $0x48] sm:$0xff] %vm40_vm1, %v720_v0  ;;  %vm631_vm8 = vcmask 130048   ;;  %s724_s15 = smov [#allocation6]  }
  0x1e   :  { %54 = vst.msk [vmem:[#allocation2 + $0x60] sm:$0xff] %vm40_vm1, %v720_v0  ;;  %57 = vst.msk [vmem:[#allocation2 + $0x78] sm:$0xff] %vm40_vm1, %v720_v0  ;;  %s653_s16 = sshll.u32 %s724_s15, 4  ;;  %s654_s16 = int_to_ptr.vmem [resolvable:$true] %s653_s16 }
  0x1f   :  { %60 = vst.msk [vmem:[#allocation2 + $0x90] sm:$0xff] %vm40_vm1, %v720_v0  ;;  %63 = vst.msk [vmem:[#allocation2 + $0xa8] sm:$0xff] %vm40_vm1, %v720_v0  ;;  %152 = vrot.lane.b32.xlu0 %v114_v16, %s721_s0  ;;  %s693_s17 = scalar_lea.vmem %s654_s16, 2048  ;;  %p698_p6 = scmp.lt.s32.totalorder %s654_s16, %s654_s16 }
  0x20   :  { %75 = vst.msk [vmem:[#allocation2 + $0x38] sm:$0xff] %vm66_vm2, %v720_v0  ;;  %78 = vst.msk [vmem:[#allocation2 + $0x50] sm:$0xff] %vm66_vm2, %v720_v0  ;;  %154 = vrot.lane.b32.xlu1 %v115_v15, %s721_s0  ;;  %p694_p5 = scmp.ne.s32.totalorder %s654_s16, %s693_s17  ;;  %p699_p7 = scmp.lt.s32.totalorder %s693_s17, %s693_s17 }
  0x21   :  { %81 = vst.msk [vmem:[#allocation2 + $0x68] sm:$0xff] %vm66_vm2, %v720_v0  ;;  %84 = vst.msk [vmem:[#allocation2 + $0x80] sm:$0xff] %vm66_vm2, %v720_v0 }
  0x22   :  { %87 = vst.msk [vmem:[#allocation2 + $0x98] sm:$0xff] %vm66_vm2, %v720_v0  ;;  %90 = vst.msk [vmem:[#allocation2 + $0xb0] sm:$0xff] %vm66_vm2, %v720_v0  ;;  %p700_p8 = por %p699_p7, %p698_p6 }
  0x23   :  { %44 = vst.msk [vmem:[#allocation2 + $0x10] sm:$0x3] %vm43_vm3, %v720_v0  ;;  %47 = vst.msk [vmem:[#allocation2 + $0x28] sm:$0x3] %vm43_vm3, %v720_v0  ;;  %156 = vrot.lane.b32.xlu0 %v116_v19, %s721_s0 }
  0x24   :  { %50 = vst.msk [vmem:[#allocation2 + $0x40] sm:$0x3] %vm43_vm3, %v720_v0  ;;  %53 = vst.msk [vmem:[#allocation2 + $0x58] sm:$0x3] %vm43_vm3, %v720_v0  ;;  %158 = vrot.lane.b32.xlu1 %v117_v20, %s721_s0  ;;  %p701_p9 = pnand %p700_p8, %p694_p5 }
  0x25   :  { %56 = vst.msk [vmem:[#allocation2 + $0x70] sm:$0x3] %vm43_vm3, %v720_v0  ;;  %59 = vst.msk [vmem:[#allocation2 + $0x88] sm:$0x3] %vm43_vm3, %v720_v0 }
  0x26   :  { %62 = vst.msk [vmem:[#allocation2 + $0xa0] sm:$0x3] %vm43_vm3, %v720_v0  ;;  %65 = vst.msk [vmem:[#allocation2 + $0xb8] sm:$0x3] %vm43_vm3, %v720_v0 }
  0x27   :  { %67 = vst.msk [vmem:[#allocation2] sm:$0xff] %vm66_vm2, %v720_v0  ;;  %71 = vst.msk [vmem:[#allocation2 + $0x18] sm:$0xff] %vm66_vm2, %v720_v0  ;;  %160 = vrot.lane.b32.xlu0 %v118_v24, %s721_s0 }
  0x28   :  { %70 = vst.msk [vmem:[#allocation2 + $0x10] sm:$0x3] %vm69_vm4, %v720_v0  ;;  %73 = vst.msk [vmem:[#allocation2 + $0x28] sm:$0x3] %vm69_vm4, %v720_v0  ;;  %162 = vrot.lane.b32.xlu1 %v119_v23, %s721_s0 }
  0x29   :  { %74 = vst.msk [vmem:[#allocation2 + $0x30] sm:$0xff] %vm66_vm2, %v720_v0  ;;  %77 = vst.msk [vmem:[#allocation2 + $0x48] sm:$0xff] %vm66_vm2, %v720_v0 }
  0x2a   :  { %80 = vst.msk [vmem:[#allocation2 + $0x60] sm:$0xff] %vm66_vm2, %v720_v0  ;;  %83 = vst.msk [vmem:[#allocation2 + $0x78] sm:$0xff] %vm66_vm2, %v720_v0 }
  0x2b   :  { %86 = vst.msk [vmem:[#allocation2 + $0x90] sm:$0xff] %vm66_vm2, %v720_v0  ;;  %89 = vst.msk [vmem:[#allocation2 + $0xa8] sm:$0xff] %vm66_vm2, %v720_v0  ;;  %164 = vrot.lane.b32.xlu0 %v120_v27, %s721_s0 }
  0x2c   :  { %76 = vst.msk [vmem:[#allocation2 + $0x40] sm:$0x3] %vm69_vm4, %v720_v0  ;;  %79 = vst.msk [vmem:[#allocation2 + $0x58] sm:$0x3] %vm69_vm4, %v720_v0  ;;  %166 = vrot.lane.b32.xlu1 %v121_v28, %s721_s0 }
  0x2d   :  { %82 = vst.msk [vmem:[#allocation2 + $0x70] sm:$0x3] %vm69_vm4, %v720_v0  ;;  %85 = vst.msk [vmem:[#allocation2 + $0x88] sm:$0x3] %vm69_vm4, %v720_v0 }
  0x2e   :  { %88 = vst.msk [vmem:[#allocation2 + $0xa0] sm:$0x3] %vm69_vm4, %v720_v0  ;;  %91 = vst.msk [vmem:[#allocation2 + $0xb8] sm:$0x3] %vm69_vm4, %v720_v0 }
  0x2f   :  { %168 = vrot.lane.b32.xlu0 %v122_v32, %s721_s0 }
  0x30   :  { %170 = vrot.lane.b32.xlu1 %v123_v31, %s721_s0 }
  0x85   :  { %v141_v33 = vpop.permute.xlu0 %140 }
  0x86   :  { %v145_v34 = vpop.permute.xlu1 %144  ;;  %189 = vst.msk [vmem:[#allocation2 + $0x1] sm:$0xff] %vm188_vm5, %v141_v33 }
  0x87   :  { %191 = vst.msk [vmem:[#allocation2 + $0x19] sm:$0xff] %vm188_vm5, %v145_v34 }
  0x89   :  { %v143_v35 = vpop.permute.xlu0 %142 }
  0x8a   :  { %v147_v36 = vpop.permute.xlu1 %146  ;;  %190 = vst.msk [vmem:[#allocation2 + $0x9] sm:$0xff] %vm188_vm5, %v143_v35 }
  0x8b   :  { %192 = vst.msk [vmem:[#allocation2 + $0x21] sm:$0xff] %vm188_vm5, %v147_v36 }
  0x8d   :  { %v889_v37 = vld [vmem:[#allocation2] sm:$0xff]  ;;  %v149_v38 = vpop.permute.xlu0 %148 }
  0x8e   :  { %v151_v39 = vpop.permute.xlu1 %150  ;;  %253 = vrot.lane.b32.xlu0 %v889_v37, %s722_s13  ;;  %193 = vst.msk [vmem:[#allocation2 + $0x31] sm:$0xff] %vm188_vm5, %v149_v38  ;;  %v905_v44 = vld [vmem:[#allocation2 + $0x18] sm:$0xff] }
  0x8f   :  { %194 = vst.msk [vmem:[#allocation2 + $0x39] sm:$0xff] %vm188_vm5, %v151_v39 }
  0x91   :  { %v895_v40 = vld [vmem:[#allocation2 + $0x8] sm:$0xff]  ;;  %v897_v41 = vld [vmem:[#allocation2 + $0x10] sm:$0x3]  ;;  %v153_v43 = vpop.permute.xlu0 %152 }
  0x92   :  { %v155_v42 = vpop.permute.xlu1 %154  ;;  %255 = vrot.lane.b32.xlu1 %v895_v40, %s722_s13  ;;  %257 = vrot.lane.b32.xlu0 %v897_v41, %s722_s13  ;;  %195 = vst.msk [vmem:[#allocation2 + $0x49] sm:$0xff] %vm188_vm5, %v153_v43  ;;  %v907_v45 = vld [vmem:[#allocation2 + $0x20] sm:$0xff]  ;;  %v915_v48 = vld [vmem:[#allocation2 + $0x28] sm:$0x3] }
  0x93   :  { %196 = vst.msk [vmem:[#allocation2 + $0x51] sm:$0xff] %vm188_vm5, %v155_v42 }
  0x95   :  { %v157_v46 = vpop.permute.xlu0 %156  ;;  %v917_v49 = vld [vmem:[#allocation2 + $0x30] sm:$0xff] }
  0x96   :  { %v159_v47 = vpop.permute.xlu1 %158  ;;  %259 = vrot.lane.b32.xlu1 %v905_v44, %s722_s13  ;;  %261 = vrot.lane.b32.xlu0 %v907_v45, %s722_s13  ;;  %197 = vst.msk [vmem:[#allocation2 + $0x61] sm:$0xff] %vm188_vm5, %v157_v46  ;;  %v925_v52 = vld [vmem:[#allocation2 + $0x38] sm:$0xff]  ;;  %v927_v53 = vld [vmem:[#allocation2 + $0x40] sm:$0x3] }
  0x97   :  { %198 = vst.msk [vmem:[#allocation2 + $0x69] sm:$0xff] %vm188_vm5, %v159_v47 }
  0x99   :  { %v161_v51 = vpop.permute.xlu0 %160  ;;  %v935_v56 = vld [vmem:[#allocation2 + $0x48] sm:$0xff] }
  0x9a   :  { %v163_v50 = vpop.permute.xlu1 %162  ;;  %263 = vrot.lane.b32.xlu1 %v915_v48, %s722_s13  ;;  %265 = vrot.lane.b32.xlu0 %v917_v49, %s722_s13  ;;  %199 = vst.msk [vmem:[#allocation2 + $0x79] sm:$0xff] %vm188_vm5, %v161_v51  ;;  %v937_v57 = vld [vmem:[#allocation2 + $0x50] sm:$0xff]  ;;  %v945_v60 = vld [vmem:[#allocation2 + $0x58] sm:$0x3] }
  0x9b   :  { %200 = vst.msk [vmem:[#allocation2 + $0x81] sm:$0xff] %vm188_vm5, %v163_v50 }
  0x9d   :  { %v165_v54 = vpop.permute.xlu0 %164  ;;  %v947_v61 = vld [vmem:[#allocation2 + $0x60] sm:$0xff] }
  0x9e   :  { %v167_v55 = vpop.permute.xlu1 %166  ;;  %267 = vrot.lane.b32.xlu1 %v925_v52, %s722_s13  ;;  %269 = vrot.lane.b32.xlu0 %v927_v53, %s722_s13  ;;  %201 = vst.msk [vmem:[#allocation2 + $0x91] sm:$0xff] %vm188_vm5, %v165_v54  ;;  %v953_v62 = vld [vmem:[#allocation2 + $0x68] sm:$0xff]  ;;  %v955_v63 = vld [vmem:[#allocation2 + $0x70] sm:$0x3] }
  0x9f   :  { %202 = vst.msk [vmem:[#allocation2 + $0x99] sm:$0xff] %vm188_vm5, %v167_v55 }
  0xa1   :  { %v169_v59 = vpop.permute.xlu0 %168  ;;  %v961_v0 = vld [vmem:[#allocation2 + $0x78] sm:$0xff] }
  0xa2   :  { %v171_v58 = vpop.permute.xlu1 %170  ;;  %271 = vrot.lane.b32.xlu1 %v935_v56, %s722_s13  ;;  %273 = vrot.lane.b32.xlu0 %v937_v57, %s722_s13  ;;  %203 = vst.msk [vmem:[#allocation2 + $0xa9] sm:$0xff] %vm188_vm5, %v169_v59  ;;  %v963_v1 = vld [vmem:[#allocation2 + $0x80] sm:$0xff]  ;;  %v969_v2 = vld [vmem:[#allocation2 + $0x88] sm:$0x3] }
  0xa3   :  { %204 = vst.msk [vmem:[#allocation2 + $0xb1] sm:$0xff] %vm188_vm5, %v171_v58 }
  0xa5   :  { %v971_v3 = vld [vmem:[#allocation2 + $0x90] sm:$0xff] }
  0xa6   :  { %275 = vrot.lane.b32.xlu1 %v945_v60, %s722_s13  ;;  %277 = vrot.lane.b32.xlu0 %v947_v61, %s722_s13  ;;  %v977_v4 = vld [vmem:[#allocation2 + $0x98] sm:$0xff]  ;;  %v979_v5 = vld [vmem:[#allocation2 + $0xa0] sm:$0x3] }
  0xa9   :  { %v985_v6 = vld [vmem:[#allocation2 + $0xa8] sm:$0xff] }
  0xaa   :  { %279 = vrot.lane.b32.xlu1 %v953_v62, %s722_s13  ;;  %281 = vrot.lane.b32.xlu0 %v955_v63, %s722_s13  ;;  %v987_v7 = vld [vmem:[#allocation2 + $0xb0] sm:$0xff]  ;;  %v993_v8 = vld [vmem:[#allocation2 + $0xb8] sm:$0x3] }
  0xae   :  { %283 = vrot.lane.b32.xlu1 %v961_v0, %s722_s13  ;;  %285 = vrot.lane.b32.xlu0 %v963_v1, %s722_s13 }
  0xb2   :  { %287 = vrot.lane.b32.xlu1 %v969_v2, %s722_s13  ;;  %289 = vrot.lane.b32.xlu0 %v971_v3, %s722_s13 }
  0xb6   :  { %291 = vrot.lane.b32.xlu1 %v977_v4, %s722_s13  ;;  %293 = vrot.lane.b32.xlu0 %v979_v5, %s722_s13 }
  0xba   :  { %295 = vrot.lane.b32.xlu1 %v985_v6, %s722_s13  ;;  %297 = vrot.lane.b32.xlu0 %v987_v7, %s722_s13 }
  0xbe   :  { %299 = vrot.lane.b32.xlu1 %v993_v8, %s722_s13  ;;  %349 = vrot.lane.b32.xlu0 %v889_v37, %s723_s14 }
  0xc2   :  { %351 = vrot.lane.b32.xlu1 %v895_v40, %s723_s14  ;;  %353 = vrot.lane.b32.xlu0 %v897_v41, %s723_s14 }
  0xc6   :  { %355 = vrot.lane.b32.xlu1 %v905_v44, %s723_s14  ;;  %357 = vrot.lane.b32.xlu0 %v907_v45, %s723_s14 }
  0xca   :  { %359 = vrot.lane.b32.xlu1 %v915_v48, %s723_s14  ;;  %361 = vrot.lane.b32.xlu0 %v917_v49, %s723_s14 }
  0xce   :  { %363 = vrot.lane.b32.xlu1 %v925_v52, %s723_s14  ;;  %365 = vrot.lane.b32.xlu0 %v927_v53, %s723_s14 }
  0xd2   :  { %367 = vrot.lane.b32.xlu1 %v935_v56, %s723_s14  ;;  %369 = vrot.lane.b32.xlu0 %v937_v57, %s723_s14 }
  0xd6   :  { %371 = vrot.lane.b32.xlu1 %v945_v60, %s723_s14  ;;  %373 = vrot.lane.b32.xlu0 %v947_v61, %s723_s14 }
  0xda   :  { %375 = vrot.lane.b32.xlu1 %v953_v62, %s723_s14  ;;  %377 = vrot.lane.b32.xlu0 %v955_v63, %s723_s14 }
  0xde   :  { %379 = vrot.lane.b32.xlu1 %v961_v0, %s723_s14  ;;  %381 = vrot.lane.b32.xlu0 %v963_v1, %s723_s14 }
  0xe2   :  { %383 = vrot.lane.b32.xlu1 %v969_v2, %s723_s14  ;;  %385 = vrot.lane.b32.xlu0 %v971_v3, %s723_s14 }
  0xe6   :  { %387 = vrot.lane.b32.xlu1 %v977_v4, %s723_s14  ;;  %389 = vrot.lane.b32.xlu0 %v979_v5, %s723_s14 }
  0xea   :  { %391 = vrot.lane.b32.xlu1 %v985_v6, %s723_s14  ;;  %393 = vrot.lane.b32.xlu0 %v987_v7, %s723_s14 }
  0xee   :  { %395 = vrot.lane.b32.xlu1 %v993_v8, %s723_s14 }
 0x100   :  { %v254_v9 = vpop.permute.xlu0 %253 }
 0x101   :  { %v325_v32 = vmul.f32 %v254_v9, %v889_v37 }
 0x104   :  { %v256_v10 = vpop.permute.xlu1 %255  ;;  %v258_v11 = vpop.permute.xlu0 %257 }
 0x105   :  { %v326_v36 = vmul.f32 %v256_v10, %v895_v40  ;;  %v327_v38 = vmul.f32 %v258_v11, %v897_v41 }
 0x108   :  { %v260_v12 = vpop.permute.xlu1 %259  ;;  %v262_v13 = vpop.permute.xlu0 %261 }
 0x109   :  { %v328_v37 = vmul.f32 %v260_v12, %v905_v44  ;;  %v329_v58 = vmul.f32 %v262_v13, %v907_v45 }
 0x10c   :  { %v264_v14 = vpop.permute.xlu1 %263  ;;  %v266_v15 = vpop.permute.xlu0 %265 }
 0x10d   :  { %v331_v45 = vmul.f32 %v266_v15, %v917_v49 }
 0x110   :  { %v268_v16 = vpop.permute.xlu1 %267  ;;  %v270_v17 = vpop.permute.xlu0 %269 }
 0x114   :  { %v1021_v18 = vpop.permute.xlu1 %271  ;;  %v1023_v19 = vpop.permute.xlu0 %273 }
 0x118   :  { %v1025_v20 = vpop.permute.xlu1 %275  ;;  %v1027_v21 = vpop.permute.xlu0 %277 }
 0x11c   :  { %v1029_v22 = vpop.permute.xlu1 %279  ;;  %v1031_v23 = vpop.permute.xlu0 %281 }
 0x120   :  { %v1033_v24 = vpop.permute.xlu1 %283  ;;  %v1035_v25 = vpop.permute.xlu0 %285 }
 0x124   :  { %v1037_v26 = vpop.permute.xlu1 %287  ;;  %v1039_v27 = vpop.permute.xlu0 %289 }
 0x128   :  { %v1041_v28 = vpop.permute.xlu1 %291  ;;  %v1043_v29 = vpop.permute.xlu0 %293 }
 0x12c   :  { %v1045_v30 = vpop.permute.xlu1 %295  ;;  %v1047_v31 = vpop.permute.xlu0 %297 }
 0x130   :  { %v1050_v33 = vpop.permute.xlu1 %299  ;;  %v350_v34 = vpop.permute.xlu0 %349 }
 0x131   :  { %1146 = vst [vmem:[#allocation9_spill] sm:$0xff] %v1050_v33  ;;  %v421_v35 = vmul.f32 %v350_v34, %v325_v32 }
 0x133   :  { %v470_v47 = vrot.slane %v421_v35, 1  ;;  %v543_v40 = vrot.slane %v421_v35, 2 }
 0x134   :  { %v352_v39 = vpop.permute.xlu1 %351  ;;  %v354_v42 = vpop.permute.xlu0 %353 }
 0x135   :  { %v422_v43 = vmul.f32 %v352_v39, %v326_v36  ;;  %v423_v46 = vmul.f32 %v354_v42, %v327_v38  ;;  %v330_v38 = vmul.f32 %v264_v14, %v915_v48 }
 0x137   :  { %v471_v50 = vrot.slane %v422_v43, 1  ;;  %v544_v51 = vrot.slane %v422_v43, 2  ;;  %v473_v54 = vrot.slane %v423_v46, 1  ;;  %v546_v55 = vrot.slane %v423_v46, 2 }
 0x138   :  { %v356_v59 = vpop.permute.xlu1 %355  ;;  %v358_v9 = vpop.permute.xlu0 %357 }
 0x139   :  { %v472_v41 = vsel %vm469_vm6, %v470_v47, %v471_v50  ;;  %v474_v10 = vsel %vm469_vm6, %v471_v50, %v473_v54  ;;  %v424_v34 = vmul.f32 %v356_v59, %v328_v37  ;;  %v425_v36 = vmul.f32 %v358_v9, %v329_v58 }
 0x13a   :  { %v526_v11 = vmul.f32 %v472_v41, %v421_v35  ;;  %v527_v32 = vmul.f32 %v474_v10, %v422_v43  ;;  %v545_v39 = vsel %vm542_vm7, %v543_v40, %v544_v51  ;;  %v547_v44 = vsel %vm542_vm7, %v544_v51, %v546_v55 }
 0x13b   :  { %v475_v42 = vrot.slane %v424_v34, 1  ;;  %v548_v33 = vrot.slane %v424_v34, 2  ;;  %v476_v50 = vrot.slane %v425_v36, 1  ;;  %v549_v35 = vrot.slane %v425_v36, 2 }
 0x13c   :  { %v599_v12 = vmul.f32 %v545_v39, %v526_v11  ;;  %v600_v13 = vmul.f32 %v547_v44, %v527_v32  ;;  %v360_v46 = vpop.permute.xlu1 %359  ;;  %v362_v47 = vpop.permute.xlu0 %361  ;;  %v332_v54 = vmul.f32 %v268_v16, %v925_v52  ;;  %v333_v58 = vmul.f32 %v270_v17, %v927_v53 }
 0x13d   :  { %v426_v43 = vmul.f32 %v360_v46, %v330_v38  ;;  %v427_v14 = vmul.f32 %v362_v47, %v331_v45  ;;  %v477_v51 = vsel %vm469_vm6, %v475_v42, %v476_v50  ;;  %v550_v40 = vsel %vm542_vm7, %v548_v33, %v549_v35 }
 0x13e   :  { %v615_v37 = vsub.f32 1.0, %v599_v12  ;;  %v616_v48 = vsub.f32 1.0, %v600_v13  ;;  %v528_v15 = vmul.f32 %v477_v51, %v424_v34  ;;  %v334_v34 = vmul.f32 %v1021_v18, %v935_v56 }
 0x13f   :  { %v478_v55 = vrot.slane %v426_v43, 1  ;;  %v551_v49 = vrot.slane %v426_v43, 2  ;;  %v480_v17 = vrot.slane %v427_v14, 1  ;;  %v335_v42 = vmul.f32 %v1023_v19, %v937_v57 }
 0x140   :  { %632 = vst.msk [vmem:[#allocation6] sm:$0xff] %vm631_vm8, %v615_v37  ;;  %633 = vst.msk [vmem:[#allocation6 + $0x8] sm:$0xff] %vm631_vm8, %v616_v48  ;;  %v364_v59 = vpop.permute.xlu1 %363  ;;  %v366_v9 = vpop.permute.xlu0 %365  ;;  %v601_v10 = vmul.f32 %v550_v40, %v528_v15  ;;  %v553_v46 = vrot.slane %v427_v14, 2  ;;  %v336_v56 = vmul.f32 %v1025_v20, %v945_v60  ;;  %v337_v57 = vmul.f32 %v1027_v21, %v947_v61 }
 0x141   :  { %v479_v52 = vsel %vm469_vm6, %v476_v50, %v478_v55  ;;  %v428_v16 = vmul.f32 %v364_v59, %v332_v54  ;;  %v429_v41 = vmul.f32 %v366_v9, %v333_v58  ;;  %v552_v53 = vsel %vm542_vm7, %v549_v35, %v551_v49 }
 0x142   :  { %v529_v11 = vmul.f32 %v479_v52, %v425_v36  ;;  %v617_v45 = vsub.f32 1.0, %v601_v10  ;;  %v338_v60 = vmul.f32 %v1029_v22, %v953_v62  ;;  %v339_v61 = vmul.f32 %v1031_v23, %v955_v63 }
 0x143   :  { %v481_v32 = vrot.slane %v428_v16, 1  ;;  %v554_v38 = vrot.slane %v428_v16, 2  ;;  %v483_v39 = vrot.slane %v429_v41, 1  ;;  %v556_v44 = vrot.slane %v429_v41, 2 }
 0x144   :  { %v602_v12 = vmul.f32 %v552_v53, %v529_v11  ;;  %v368_v13 = vpop.permute.xlu1 %367  ;;  %v370_v33 = vpop.permute.xlu0 %369  ;;  %634 = vst.msk [vmem:[#allocation6 + $0x10] sm:$0xff] %vm631_vm8, %v617_v45 }
 0x145   :  { %v482_v36 = vsel %vm469_vm6, %v480_v17, %v481_v32  ;;  %v484_v47 = vsel %vm469_vm6, %v481_v32, %v483_v39  ;;  %v430_v54 = vmul.f32 %v368_v13, %v334_v34  ;;  %v555_v18 = vsel %vm542_vm7, %v553_v46, %v554_v38 }
 0x146   :  { %v618_v50 = vsub.f32 1.0, %v602_v12  ;;  %v530_v35 = vmul.f32 %v482_v36, %v427_v14  ;;  %v531_v43 = vmul.f32 %v484_v47, %v428_v16  ;;  %v557_v37 = vsel %vm542_vm7, %v554_v38, %v556_v44 }
 0x147   :  { %v431_v48 = vmul.f32 %v370_v33, %v335_v42  ;;  %v485_v51 = vrot.slane %v430_v54, 1  ;;  %v558_v49 = vrot.slane %v430_v54, 2  ;;  %v340_v13 = vmul.f32 %v1033_v24, %v961_v0 }
 0x148   :  { %635 = vst.msk [vmem:[#allocation6 + $0x18] sm:$0xff] %vm631_vm8, %v618_v50  ;;  %v603_v19 = vmul.f32 %v555_v18, %v530_v35  ;;  %v604_v58 = vmul.f32 %v557_v37, %v531_v43  ;;  %v372_v55 = vpop.permute.xlu1 %371  ;;  %v374_v14 = vpop.permute.xlu0 %373  ;;  %v341_v47 = vmul.f32 %v1035_v25, %v963_v1  ;;  %v342_v0 = vmul.f32 %v1037_v26, %v969_v2 }
 0x149   :  { %v486_v15 = vrot.slane %v431_v48, 1  ;;  %v559_v59 = vrot.slane %v431_v48, 2  ;;  %v432_v9 = vmul.f32 %v372_v55, %v336_v56  ;;  %v433_v52 = vmul.f32 %v374_v14, %v337_v57 }
 0x14a   :  { %v619_v20 = vsub.f32 1.0, %v603_v19  ;;  %v620_v40 = vsub.f32 1.0, %v604_v58  ;;  %v343_v1 = vmul.f32 %v1039_v27, %v971_v3  ;;  %v344_v2 = vmul.f32 %v1041_v28, %v977_v4 }
 0x14b   :  { %v487_v21 = vsel %vm469_vm6, %v485_v51, %v486_v15  ;;  %v488_v16 = vrot.slane %v432_v9, 1  ;;  %v561_v41 = vrot.slane %v432_v9, 2  ;;  %v560_v17 = vsel %vm542_vm7, %v558_v49, %v559_v59 }
 0x14c   :  { %636 = vst.msk [vmem:[#allocation6 + $0x20] sm:$0xff] %vm631_vm8, %v619_v20  ;;  %637 = vst.msk [vmem:[#allocation6 + $0x28] sm:$0xff] %vm631_vm8, %v620_v40  ;;  %v532_v10 = vmul.f32 %v487_v21, %v430_v54  ;;  %v376_v11 = vpop.permute.xlu1 %375  ;;  %v378_v53 = vpop.permute.xlu0 %377  ;;  %v490_v23 = vrot.slane %v433_v52, 1  ;;  %v563_v50 = vrot.slane %v433_v52, 2  ;;  %v345_v3 = vmul.f32 %v1043_v29, %v979_v5 }
 0x14d   :  { %v489_v62 = vsel %vm469_vm6, %v486_v15, %v488_v16  ;;  %v434_v22 = vmul.f32 %v376_v11, %v338_v60  ;;  %v435_v32 = vmul.f32 %v378_v53, %v339_v61  ;;  %v562_v63 = vsel %vm542_vm7, %v559_v59, %v561_v41 }
 0x14e   :  { %v605_v38 = vmul.f32 %v560_v17, %v532_v10  ;;  %v533_v39 = vmul.f32 %v489_v62, %v431_v48 }
 0x14f   :  { %v491_v44 = vrot.slane %v434_v22, 1  ;;  %v564_v34 = vrot.slane %v434_v22, 2  ;;  %v493_v45 = vrot.slane %v435_v32, 1  ;;  %v566_v12 = vrot.slane %v435_v32, 2 }
 0x150   :  { %v621_v33 = vsub.f32 1.0, %v605_v38  ;;  %v606_v42 = vmul.f32 %v562_v63, %v533_v39  ;;  %v380_v46 = vpop.permute.xlu1 %379  ;;  %v382_v36 = vpop.permute.xlu0 %381  ;;  %v346_v32 = vmul.f32 %v1045_v30, %v985_v6  ;;  %v1147_v6 = vld [vmem:[#allocation9_spill] sm:$0xff] }
 0x151   :  { %v492_v35 = vsel %vm469_vm6, %v490_v23, %v491_v44  ;;  %v494_v43 = vsel %vm469_vm6, %v491_v44, %v493_v45  ;;  %v436_v37 = vmul.f32 %v380_v46, %v340_v13  ;;  %v565_v24 = vsel %vm542_vm7, %v563_v50, %v564_v34 }
 0x152   :  { %638 = vst.msk [vmem:[#allocation6 + $0x30] sm:$0xff] %vm631_vm8, %v621_v33  ;;  %v622_v54 = vsub.f32 1.0, %v606_v42  ;;  %v534_v56 = vmul.f32 %v492_v35, %v433_v52  ;;  %v535_v18 = vmul.f32 %v494_v43, %v434_v22  ;;  %v567_v48 = vsel %vm542_vm7, %v564_v34, %v566_v12 }
 0x153   :  { %v437_v57 = vmul.f32 %v382_v36, %v341_v47  ;;  %v495_v58 = vrot.slane %v436_v37, 1  ;;  %v568_v14 = vrot.slane %v436_v37, 2  ;;  %v347_v44 = vmul.f32 %v1047_v31, %v987_v7 }
 0x154   :  { %639 = vst.msk [vmem:[#allocation6 + $0x38] sm:$0xff] %vm631_vm8, %v622_v54  ;;  %v607_v25 = vmul.f32 %v565_v24, %v534_v56  ;;  %v608_v19 = vmul.f32 %v567_v48, %v535_v18  ;;  %v384_v51 = vpop.permute.xlu1 %383  ;;  %v386_v55 = vpop.permute.xlu0 %385  ;;  %v348_v30 = vmul.f32 %v1147_v6, %v993_v8 }
 0x155   :  { %v496_v49 = vrot.slane %v437_v57, 1  ;;  %v569_v15 = vrot.slane %v437_v57, 2  ;;  %v438_v59 = vmul.f32 %v384_v51, %v342_v0  ;;  %v439_v60 = vmul.f32 %v386_v55, %v343_v1 }
 0x156   :  { %v623_v26 = vsub.f32 1.0, %v607_v25  ;;  %v624_v9 = vsub.f32 1.0, %v608_v19 }
 0x157   :  { %v497_v27 = vsel %vm469_vm6, %v495_v58, %v496_v49  ;;  %v498_v20 = vrot.slane %v438_v59, 1  ;;  %v571_v40 = vrot.slane %v438_v59, 2  ;;  %v570_v16 = vsel %vm542_vm7, %v568_v14, %v569_v15 }
 0x158   :  { %640 = vst.msk [vmem:[#allocation6 + $0x40] sm:$0xff] %vm631_vm8, %v623_v26  ;;  %641 = vst.msk [vmem:[#allocation6 + $0x48] sm:$0xff] %vm631_vm8, %v624_v9  ;;  %v536_v52 = vmul.f32 %v497_v27, %v436_v37  ;;  %v388_v61 = vpop.permute.xlu1 %387  ;;  %v390_v21 = vpop.permute.xlu0 %389  ;;  %v500_v29 = vrot.slane %v439_v60, 1  ;;  %v573_v34 = vrot.slane %v439_v60, 2 }
 0x159   :  { %v499_v4 = vsel %vm469_vm6, %v496_v49, %v498_v20  ;;  %v440_v28 = vmul.f32 %v388_v61, %v344_v2  ;;  %v441_v41 = vmul.f32 %v390_v21, %v345_v3  ;;  %v572_v5 = vsel %vm542_vm7, %v569_v15, %v571_v40 }
 0x15a   :  { %v609_v10 = vmul.f32 %v570_v16, %v536_v52  ;;  %v537_v11 = vmul.f32 %v499_v4, %v437_v57 }
 0x15b   :  { %v501_v53 = vrot.slane %v440_v28, 1  ;;  %v574_v17 = vrot.slane %v440_v28, 2  ;;  %v503_v62 = vrot.slane %v441_v41, 1  ;;  %v576_v22 = vrot.slane %v441_v41, 2 }
 0x15c   :  { %v625_v38 = vsub.f32 1.0, %v609_v10  ;;  %v610_v39 = vmul.f32 %v572_v5, %v537_v11  ;;  %v392_v63 = vpop.permute.xlu1 %391  ;;  %v394_v23 = vpop.permute.xlu0 %393 }
 0x15d   :  { %v502_v45 = vsel %vm469_vm6, %v500_v29, %v501_v53  ;;  %v504_v12 = vsel %vm469_vm6, %v501_v53, %v503_v62  ;;  %v442_v46 = vmul.f32 %v392_v63, %v346_v32  ;;  %v575_v36 = vsel %vm542_vm7, %v573_v34, %v574_v17 }
 0x15e   :  { %642 = vst.msk [vmem:[#allocation6 + $0x50] sm:$0xff] %vm631_vm8, %v625_v38  ;;  %v626_v13 = vsub.f32 1.0, %v610_v39  ;;  %v538_v33 = vmul.f32 %v502_v45, %v439_v60  ;;  %v539_v42 = vmul.f32 %v504_v12, %v440_v28  ;;  %v577_v47 = vsel %vm542_vm7, %v574_v17, %v576_v22 }
 0x15f   :  { %v443_v50 = vmul.f32 %v394_v23, %v347_v44  ;;  %v505_v35 = vrot.slane %v442_v46, 1  ;;  %v578_v54 = vrot.slane %v442_v46, 2 }
 0x160   :  { %643 = vst.msk [vmem:[#allocation6 + $0x58] sm:$0xff] %vm631_vm8, %v626_v13  ;;  %v611_v7 = vmul.f32 %v575_v36, %v538_v33  ;;  %v612_v31 = vmul.f32 %v577_v47, %v539_v42  ;;  %v396_v43 = vpop.permute.xlu1 %395 }
 0x161   :  { %v506_v56 = vrot.slane %v443_v50, 1  ;;  %v579_v18 = vrot.slane %v443_v50, 2  ;;  %v444_v37 = vmul.f32 %v396_v43, %v348_v30 }
 0x162   :  { %v627_v0 = vsub.f32 1.0, %v611_v7  ;;  %v628_v24 = vsub.f32 1.0, %v612_v31 }
 0x163   :  { %v507_v48 = vsel %vm469_vm6, %v505_v35, %v506_v56  ;;  %v508_v8 = vrot.slane %v444_v37, 1  ;;  %v581_v57 = vrot.slane %v444_v37, 2  ;;  %v580_v25 = vsel %vm542_vm7, %v578_v54, %v579_v18 }
 0x164   :  { %644 = vst.msk [vmem:[#allocation6 + $0x60] sm:$0xff] %vm631_vm8, %v627_v0  ;;  %645 = vst.msk [vmem:[#allocation6 + $0x68] sm:$0xff] %vm631_vm8, %v628_v24  ;;  %v540_v1 = vmul.f32 %v507_v48, %v442_v46 }
 0x165   :  { %v509_v19 = vsel %vm469_vm6, %v506_v56, %v508_v8  ;;  %v582_v55 = vsel %vm542_vm7, %v579_v18, %v581_v57 }
 0x166   :  { %v613_v58 = vmul.f32 %v580_v25, %v540_v1  ;;  %v541_v51 = vmul.f32 %v509_v19, %v443_v50 }
 0x168   :  { %v629_v14 = vsub.f32 1.0, %v613_v58  ;;  %v614_v49 = vmul.f32 %v582_v55, %v541_v51 }
 0x16a   :  { %646 = vst.msk [vmem:[#allocation6 + $0x70] sm:$0xff] %vm631_vm8, %v629_v14  ;;  %v630_v15 = vsub.f32 1.0, %v614_v49 }
 0x16c   :  { %647 = vst.msk [vmem:[#allocation6 + $0x78] sm:$0xff] %vm631_vm8, %v630_v15 }
 0x16d   :  { %704 = shalt.err (!%p701_p9)
}
 0x16e   :  { %659 = dma.vmem_to_hbm [thread:$0]  %s654_s16, 2048, %s1145_s1, [#allocation5], %s718_s9, %s718_s9, %s719_s10  }
 0x16f   :  { %715 = dma.done.wait [#allocation5], 2048  }
 0x170   :  { %716 = vsyncadd [#allocation5], 4294965248 }
 0x171   :  { %663 = vsyncpa [#allocation4], 1 }
 0x172   :  { %664 = vsyncpa [#allocation5], 1 }

</bundles_post_ra>
